<compile_context>
chip_gen: v7x
topology: tpu7x:2x2x1
jax: 0.10.0
libtpu: 0.0.40
codegen_flags: <defaults>
</compile_context>

<pallas_src>
import functools

import jax
import jax.numpy as jnp
from jax.experimental import pallas as pl
from jax.experimental.pallas import tpu as pltpu

BN_EPS = 1e-5
L2_EPS = 1e-12                       # F.normalize eps
_VMEM_LIMIT = 32 * 1024 * 1024       # explicit; safe on v5e/v6e/v7x
_HI = jax.lax.Precision.HIGHEST


def _round_up(v, mult):
    return ((v + mult - 1) // mult) * mult


def _pick_chunk(s_tile, target):
    """Largest lane sub-chunk <= target that divides s_tile (s_tile % 128 == 0)."""
    if s_tile <= target:
        return s_tile
    for c in (512, 384, 256, 128):
        if s_tile % c == 0:
            return c
    return 128


# --------------------------------------------------------------------------
# Kernel A: per-split resident accumulators of colsum(x) and Gram = X X^T.
# Grid = (num_splits ["parallel"], N ["arbitrary"], tiles-per-split ["arbitrary"]).
# Blocks are (1, C, S_tile): channels on sublanes, spatial on lanes (raw NCDHW).
# --------------------------------------------------------------------------
def _stats_kernel(x_ref, colsum_ref, gram_ref, *,
                  s_total, s_tile, tiles_per_split, ragged):
    b = pl.program_id(1)
    t = pl.program_id(2)

    @pl.when(jnp.logical_and(b == 0, t == 0))
    def _():
        colsum_ref[...] = jnp.zeros_like(colsum_ref)
        gram_ref[...] = jnp.zeros_like(gram_ref)

    x = x_ref[0]                                       # (C, s_tile)
    if ragged:                                         # mask garbage past S (exact no-op)
        g = pl.program_id(0)
        s_start = (g * tiles_per_split + t) * s_tile
        lane = jax.lax.broadcasted_iota(jnp.int32, x.shape, 1)
        x = jnp.where(lane + s_start < s_total, x, 0.0)

    colsum_ref[...] += jnp.sum(x, axis=-1, keepdims=True)[None]
    # NT-form Gram (contract the lane/spatial axis of both operands): native MXU
    # matmul, no explicit XLU transpose of the (C, s_tile) tile.
    gram_ref[0] += jax.lax.dot_general(
        x, x, (((1,), (1,)), ((), ())), preferred_element_type=jnp.float32)


# --------------------------------------------------------------------------
# Kernel B: BN-folded conv1 + ReLU + conv2 + per-voxel L2 normalize.
# Reads (1, C, S_tile) from NCDHW x, writes (1, P, S_tile) to NCDHW output.
# Compute is chunked over 512-lane sub-chunks to keep VMEM temps small while
# the DMA tile stays large.
# --------------------------------------------------------------------------
def _fused_head_kernel(x_ref, w1_ref, b1_ref, w2_ref, b2_ref, o_ref, *,
                       chunk, s_total, s_tile, ragged):
    w1 = w1_ref[...]        # (C, C)  conv1 with BN folded in
    b1 = b1_ref[...]        # (C, 1)
    w2 = w2_ref[...]        # (P, C)
    b2 = b2_ref[...]        # (P, 1)

    def body(j, carry):
        off = pl.multiple_of(j * chunk, chunk)
        x = x_ref[0, :, pl.ds(off, chunk)]             # (C, chunk)
        if ragged:
            s_start = pl.program_id(1) * s_tile + off
            lane = jax.lax.broadcasted_iota(jnp.int32, x.shape, 1)
            x = jnp.where(lane + s_start < s_total, x, 0.0)
        h = jnp.dot(w1, x, preferred_element_type=jnp.float32) + b1
        a = jnp.maximum(h, 0.0)                        # BN already folded -> ReLU only
        y = jnp.dot(w2, a, preferred_element_type=jnp.float32) + b2
        sq = jnp.sum(y * y, axis=0, keepdims=True)     # (1, chunk) sublane reduction
        # F.normalize: y / max(||y||, eps) == y * rsqrt(max(||y||^2, eps^2))  (EUP)
        o_ref[0, :, pl.ds(off, chunk)] = y * jax.lax.rsqrt(
            jnp.maximum(sq, L2_EPS * L2_EPS))
        return carry

    jax.lax.fori_loop(0, s_tile // chunk, body, 0, unroll=True)


@functools.partial(jax.jit,
                   static_argnames=("s_tile_stats", "s_tile_fused", "chunk"))
def projection_head_forward(x, params, s_tile_stats=8192, s_tile_fused=4096,
                            chunk=512):
    """x: (N, C, D, H, W) float32 NCDHW. Returns (N, P, D, H, W) float32."""
    n, c, d, h, w = x.shape
    p = params["w2"].shape[0]
    s = d * h * w
    m = n * s

    # Channels-as-sublane layout straight out of NCDHW: free reshape, no HBM copy.
    x3 = x.reshape(n, c, s)

    s_round = _round_up(s, 128)
    st_a = min(_round_up(s_tile_stats, 128), s_round)
    st_b = min(_round_up(s_tile_fused, 128), s_round)
    ck = _pick_chunk(st_b, chunk)

    # ---- Kernel A: per-split colsum + Gram accumulation (x read once, no round trip)
    tiles_a = pl.cdiv(s, st_a)
    splits = 2 if (tiles_a % 2 == 0 and tiles_a >= 2) else 1   # balanced megacore split
    tps = tiles_a // splits
    ragged_a = (s % st_a) != 0

    stats_kernel = functools.partial(
        _stats_kernel, s_total=s, s_tile=st_a, tiles_per_split=tps, ragged=ragged_a)
    colsum_s, gram_s = pl.pallas_call(
        stats_kernel,
        out_shape=(
            jax.ShapeDtypeStruct((splits, c, 1), jnp.float32),
            jax.ShapeDtypeStruct((splits, c, c), jnp.float32),
        ),
        grid_spec=pltpu.PrefetchScalarGridSpec(
            num_scalar_prefetch=0,
            grid=(splits, n, tps),
            in_specs=[pl.BlockSpec((1, c, st_a),
                                   lambda g, b, t: (b, 0, g * tps + t))],
            out_specs=[
                pl.BlockSpec((1, c, 1), lambda g, b, t: (g, 0, 0)),
                pl.BlockSpec((1, c, c), lambda g, b, t: (g, 0, 0)),
            ],
        ),
        compiler_params=pltpu.CompilerParams(
            dimension_semantics=("parallel", "arbitrary", "arbitrary"),
            vmem_limit_bytes=_VMEM_LIMIT),
    )(x3)

    colsum = jnp.sum(colsum_s, axis=0)[:, 0]           # (C,)  sum_i x_i
    gram = jnp.sum(gram_s, axis=0)                      # (C, C) = X X^T

    # ---- Analytic train-mode BN stats of h = conv1(x); fold BN into conv1.
    w1 = params["w1"]                                    # (C_out, C_in)
    b1 = params["b1"]
    mf = jnp.float32(m)
    sw = jnp.dot(w1, colsum, precision=_HI)              # (C,) = sum_i w_j . x_i
    mean = sw / mf + b1
    quad = jnp.sum(jnp.dot(w1, gram, precision=_HI) * w1, axis=1)   # w_j^T G w_j
    sum_h2 = quad + 2.0 * b1 * sw + mf * b1 * b1
    # NOTE: E[h^2]-E[h]^2 can cancel when |mean| >> std on huge M; clamped at 0.
    var = jnp.maximum(sum_h2 / mf - mean * mean, 0.0)    # biased variance
    inv_std = jax.lax.rsqrt(var + BN_EPS)
    scale = params["gamma"] * inv_std
    shift = params["beta"] - mean * scale
    w1f = (scale[:, None] * w1).astype(jnp.float32)      # BN folded into conv1
    b1f = (b1 * scale + shift).reshape(c, 1).astype(jnp.float32)
    w2 = params["w2"].astype(jnp.float32)                # (P, C)
    b2 = params["b2"].reshape(p, 1).astype(jnp.float32)
    # TODO(synk): BatchNorm3d running-stats (momentum) buffer updates are a training
    # side effect only and are not emitted; the forward output is unaffected.

    # ---- Kernel B: folded conv1 + ReLU + conv2 + L2 norm, NCDHW in / NCDHW out.
    tiles_b = pl.cdiv(s, st_b)
    ragged_b = (s % st_b) != 0
    fused_kernel = functools.partial(
        _fused_head_kernel, chunk=ck, s_total=s, s_tile=st_b, ragged=ragged_b)
    out3 = pl.pallas_call(
        fused_kernel,
        out_shape=jax.ShapeDtypeStruct((n, p, s), jnp.float32),
        grid_spec=pltpu.PrefetchScalarGridSpec(
            num_scalar_prefetch=0,
            grid=(n, tiles_b),
            in_specs=[
                pl.BlockSpec((1, c, st_b), lambda b, t: (b, 0, t)),
                pl.BlockSpec((c, c), lambda b, t: (0, 0)),
                pl.BlockSpec((c, 1), lambda b, t: (0, 0)),
                pl.BlockSpec((p, c), lambda b, t: (0, 0)),
                pl.BlockSpec((p, 1), lambda b, t: (0, 0)),
            ],
            out_specs=pl.BlockSpec((1, p, st_b), lambda b, t: (b, 0, t)),
        ),
        compiler_params=pltpu.CompilerParams(
            dimension_semantics=("parallel", "parallel"),
            vmem_limit_bytes=_VMEM_LIMIT),
    )(x3, w1f, b1f, w2, b2)

    return out3.reshape(n, p, d, h, w)                   # free reshape to NCDHW


# --------------------------------------------------------------------------
# Pure-JAX reference (training-mode BatchNorm semantics, like a fresh nn.Module).
# --------------------------------------------------------------------------
def projection_head_reference(x, params):
    n, c, d, h, w = x.shape
    xm = jnp.transpose(x, (0, 2, 3, 4, 1)).reshape(-1, c)
    hm = jnp.dot(xm, params["w1"].T, precision=_HI) + params["b1"]
    mean = hm.mean(axis=0)
    var = hm.var(axis=0)                       # biased
    hn = (hm - mean) / jnp.sqrt(var + BN_EPS) * params["gamma"] + params["beta"]
    t = jnp.maximum(hn, 0.0)
    y = jnp.dot(t, params["w2"].T, precision=_HI) + params["b2"]
    norm = jnp.sqrt(jnp.sum(y * y, axis=-1, keepdims=True))
    out = y / jnp.maximum(norm, L2_EPS)
    p = params["w2"].shape[0]
    return jnp.transpose(out.reshape(n, d, h, w, p), (0, 4, 1, 2, 3))


def init_params(key, dim_in, proj_dim):
    k1, k2, k3, k4 = jax.random.split(key, 4)
    return {
        # Conv3d(dim_in, dim_in, 1): weight (out, in) since kernel is 1x1x1
        "w1": jax.random.normal(k1, (dim_in, dim_in), jnp.float32) * 0.1,
        "b1": jax.random.normal(k2, (dim_in,), jnp.float32) * 0.01,
        # BatchNorm3d(dim_in)
        "gamma": jnp.ones((dim_in,), jnp.float32),
        "beta": jnp.zeros((dim_in,), jnp.float32),
        # Conv3d(dim_in, proj_dim, 1)
        "w2": jax.random.normal(k3, (proj_dim, dim_in), jnp.float32) * 0.1,
        "b2": jax.random.normal(k4, (proj_dim,), jnp.float32) * 0.01,
    }


if __name__ == "__main__":
    key = jax.random.PRNGKey(0)
    kx, kp = jax.random.split(key)

    # Small 3D volume: N=2, dim_in=16, D=4, H=8, W=8, proj_dim=32
    N, DIM_IN, D, H, W = 2, 16, 4, 8, 8
    PROJ_DIM = 32

    x = jax.random.normal(kx, (N, DIM_IN, D, H, W), jnp.float32)
    params = init_params(kp, DIM_IN, PROJ_DIM)

    out = jax.block_until_ready(projection_head_forward(x, params))
    ref = jax.block_until_ready(projection_head_reference(x, params))

    assert out.shape == (N, PROJ_DIM, D, H, W), out.shape
    assert bool(jnp.allclose(out, ref, atol=1e-3, rtol=1e-3)), (
        float(jnp.max(jnp.abs(out - ref))))

    print("KERNEL_OK")
</pallas_src>

<mosaic_0001>
module attributes {stable_mosaic.version = 11 : i64} {
  func.func @_stats_kernel(%arg0: i32, %arg1: i32, %arg2: i32, %arg3: memref<1x16x256xf32, #tpu.memory_space<vmem>>, %arg4: memref<1x16x1xf32, #tpu.memory_space<vmem>>, %arg5: memref<1x16x16xf32, #tpu.memory_space<vmem>>) attributes {dimension_semantics = [#tpu.dimension_semantics<parallel>, #tpu.dimension_semantics<arbitrary>, #tpu.dimension_semantics<arbitrary>], iteration_bounds = array<i64: 1, 2, 1>, scalar_prefetch = 0 : i64, scratch_operands = 0 : i64, tpu.core_type = #tpu.core_type<tc>, window_params = [{transform_indices = @transform_0, window_bounds = array<i64: 1, 16, 256>}, {transform_indices = @transform_1, window_bounds = array<i64: 1, 16, 1>}, {transform_indices = @transform_2, window_bounds = array<i64: 1, 16, 16>}]} {
    %c0_i32 = arith.constant 0 : i32
    %0 = arith.cmpi eq, %arg1, %c0_i32 : i32
    %c0_i32_0 = arith.constant 0 : i32
    %1 = arith.cmpi eq, %arg2, %c0_i32_0 : i32
    %2 = arith.andi %0, %1 : i1
    %3 = arith.extui %2 : i1 to i32
    %c0_i32_1 = arith.constant 0 : i32
    %4 = arith.cmpi ne, %3, %c0_i32_1 : i32
    scf.if %4 {
      %cst_17 = arith.constant 0.000000e+00 : f32
      %20 = vector.broadcast %cst_17 : f32 to vector<1x16x1xf32>
      %c0_18 = arith.constant 0 : index
      %c0_19 = arith.constant 0 : index
      %c0_20 = arith.constant 0 : index
      %21 = vector.load %arg4[%c0_18, %c0_19, %c0_20] : memref<1x16x1xf32, #tpu.memory_space<vmem>>, vector<1x16x1xf32>
      tpu.vector_store %arg4[%c0_18, %c0_19, %c0_20], %20 {strides = array<i32>} : memref<1x16x1xf32, #tpu.memory_space<vmem>>, vector<1x16x1xf32>,
      %cst_21 = arith.constant 0.000000e+00 : f32
      %22 = vector.broadcast %cst_21 : f32 to vector<1x16x16xf32>
      %c0_22 = arith.constant 0 : index
      %c0_23 = arith.constant 0 : index
      %c0_24 = arith.constant 0 : index
      %23 = vector.load %arg5[%c0_22, %c0_23, %c0_24] : memref<1x16x16xf32, #tpu.memory_space<vmem>>, vector<1x16x16xf32>
      tpu.vector_store %arg5[%c0_22, %c0_23, %c0_24], %22 {strides = array<i32>} : memref<1x16x16xf32, #tpu.memory_space<vmem>>, vector<1x16x16xf32>,
    } else {
    }
    %c0 = arith.constant 0 : index
    %c0_2 = arith.constant 0 : index
    %c0_3 = arith.constant 0 : index
    %5 = vector.load %arg3[%c0, %c0_2, %c0_3] : memref<1x16x256xf32, #tpu.memory_space<vmem>>, vector<1x16x256xf32>
    %6 = vector.shape_cast %5 : vector<1x16x256xf32> to vector<16x256xf32>
    %c0_4 = arith.constant 0 : index
    %c0_5 = arith.constant 0 : index
    %c0_6 = arith.constant 0 : index
    %7 = vector.load %arg4[%c0_4, %c0_5, %c0_6] : memref<1x16x1xf32, #tpu.memory_space<vmem>>, vector<1x16x1xf32>
    %cst = arith.constant dense<0.000000e+00> : vector<16xf32>
    %8 = vector.multi_reduction <add>, %6, %cst [1] : vector<16x256xf32> to vector<16xf32>
    %9 = vector.shape_cast %8 : vector<16xf32> to vector<16x1xf32>
    %10 = vector.shape_cast %9 : vector<16x1xf32> to vector<1x16x1xf32>
    %11 = arith.addf %7, %10 : vector<1x16x1xf32>
    %c0_7 = arith.constant 0 : index
    %c0_8 = arith.constant 0 : index
    %c0_9 = arith.constant 0 : index
    %12 = vector.load %arg4[%c0_7, %c0_8, %c0_9] : memref<1x16x1xf32, #tpu.memory_space<vmem>>, vector<1x16x1xf32>
    tpu.vector_store %arg4[%c0_7, %c0_8, %c0_9], %11 {strides = array<i32>} : memref<1x16x1xf32, #tpu.memory_space<vmem>>, vector<1x16x1xf32>,
    %c0_10 = arith.constant 0 : index
    %c0_11 = arith.constant 0 : index
    %c0_12 = arith.constant 0 : index
    %13 = vector.load %arg5[%c0_10, %c0_11, %c0_12] : memref<1x16x16xf32, #tpu.memory_space<vmem>>, vector<1x16x16xf32>
    %14 = vector.shape_cast %13 : vector<1x16x16xf32> to vector<16x16xf32>
    %cst_13 = arith.constant dense<0.000000e+00> : vector<16x16xf32>
    %15 = tpu.matmul %6, %6, %cst_13 {dimension_numbers = #tpu.dot_dimension_numbers<[1], [1], [0], [0], [0, 0, 1, 0], [], []>} : vector<16x256xf32>, vector<16x256xf32>, vector<16x16xf32> -> vector<16x16xf32>
    %16 = arith.addf %14, %15 : vector<16x16xf32>
    %c0_14 = arith.constant 0 : index
    %c0_15 = arith.constant 0 : index
    %c0_16 = arith.constant 0 : index
    %17 = vector.load %arg5[%c0_14, %c0_15, %c0_16] : memref<1x16x16xf32, #tpu.memory_space<vmem>>, vector<1x16x16xf32>
    %18 = vector.shape_cast %17 : vector<1x16x16xf32> to vector<16x16xf32>
    %19 = vector.shape_cast %16 : vector<16x16xf32> to vector<1x16x16xf32>
    tpu.vector_store %arg5[%c0_14, %c0_15, %c0_16], %19 {strides = array<i32>} : memref<1x16x16xf32, #tpu.memory_space<vmem>>, vector<1x16x16xf32>,
    return
  }
  func.func @transform_0(%arg0: i32, %arg1: i32, %arg2: i32) -> (i32, i32, i32) {
    %c1_i32 = arith.constant 1 : i32
    %0 = arith.muli %arg0, %c1_i32 : i32
    %1 = arith.addi %0, %arg2 : i32
    %c0_i32 = arith.constant 0 : i32
    %c0_i32_0 = arith.constant 0 : i32
    return %arg1, %c0_i32, %1 : i32, i32, i32
  }
  func.func @transform_1(%arg0: i32, %arg1: i32, %arg2: i32) -> (i32, i32, i32) {
    %c0_i32 = arith.constant 0 : i32
    %c0_i32_0 = arith.constant 0 : i32
    %c0_i32_1 = arith.constant 0 : i32
    return %arg0, %c0_i32, %c0_i32_0 : i32, i32, i32
  }
  func.func @transform_2(%arg0: i32, %arg1: i32, %arg2: i32) -> (i32, i32, i32) {
    %c0_i32 = arith.constant 0 : i32
    %c0_i32_0 = arith.constant 0 : i32
    %c0_i32_1 = arith.constant 0 : i32
    return %arg0, %c0_i32, %c0_i32_0 : i32, i32, i32
  }
}

module attributes {stable_mosaic.version = 11 : i64} {
  func.func @_fused_head_kernel(%arg0: i32, %arg1: i32, %arg2: memref<1x16x256xf32, #tpu.memory_space<vmem>>, %arg3: memref<16x16xf32, #tpu.memory_space<vmem>>, %arg4: memref<16x1xf32, #tpu.memory_space<vmem>>, %arg5: memref<32x16xf32, #tpu.memory_space<vmem>>, %arg6: memref<32x1xf32, #tpu.memory_space<vmem>>, %arg7: memref<1x32x256xf32, #tpu.memory_space<vmem>>) attributes {dimension_semantics = [#tpu.dimension_semantics<parallel>, #tpu.dimension_semantics<parallel>], iteration_bounds = array<i64: 2, 1>, scalar_prefetch = 0 : i64, scratch_operands = 0 : i64, tpu.core_type = #tpu.core_type<tc>, window_params = [{transform_indices = @transform_0, window_bounds = array<i64: 1, 16, 256>}, {pipeline_mode = #tpu.pipeline_mode<synchronous>, transform_indices = @transform_1, window_bounds = array<i64: 16, 16>}, {pipeline_mode = #tpu.pipeline_mode<synchronous>, transform_indices = @transform_2, window_bounds = array<i64: 16, 1>}, {pipeline_mode = #tpu.pipeline_mode<synchronous>, transform_indices = @transform_3, window_bounds = array<i64: 32, 16>}, {pipeline_mode = #tpu.pipeline_mode<synchronous>, transform_indices = @transform_4, window_bounds = array<i64: 32, 1>}, {transform_indices = @transform_5, window_bounds = array<i64: 1, 32, 256>}]} {
    %c0 = arith.constant 0 : index
    %c0_0 = arith.constant 0 : index
    %0 = vector.load %arg3[%c0, %c0_0] : memref<16x16xf32, #tpu.memory_space<vmem>>, vector<16x16xf32>
    %c0_1 = arith.constant 0 : index
    %c0_2 = arith.constant 0 : index
    %1 = vector.load %arg4[%c0_1, %c0_2] : memref<16x1xf32, #tpu.memory_space<vmem>>, vector<16x1xf32>
    %c0_3 = arith.constant 0 : index
    %c0_4 = arith.constant 0 : index
    %2 = vector.load %arg5[%c0_3, %c0_4] : memref<32x16xf32, #tpu.memory_space<vmem>>, vector<32x16xf32>
    %c0_5 = arith.constant 0 : index
    %c0_6 = arith.constant 0 : index
    %3 = vector.load %arg6[%c0_5, %c0_6] : memref<32x1xf32, #tpu.memory_space<vmem>>, vector<32x1xf32>
    %c0_i32 = arith.constant 0 : i32
    %c256_i32 = arith.constant 256 : i32
    %4 = arith.muli %c0_i32, %c256_i32 : i32
    %5 = tpu.assume_multiple %4, 256 : i32
    %c0_7 = arith.constant 0 : index
    %c0_8 = arith.constant 0 : index
    %6 = arith.index_cast %5 : i32 to index
    %7 = vector.load %arg2[%c0_7, %c0_8, %6] : memref<1x16x256xf32, #tpu.memory_space<vmem>>, vector<1x16x256xf32>
    %8 = vector.shape_cast %7 : vector<1x16x256xf32> to vector<16x256xf32>
    %cst = arith.constant dense<0.000000e+00> : vector<16x256xf32>
    %9 = tpu.matmul %0, %8, %cst {dimension_numbers = #tpu.dot_dimension_numbers<[1], [0], [0], [1], [0, 0, 1, 1], [], []>} : vector<16x16xf32>, vector<16x256xf32>, vector<16x256xf32> -> vector<16x256xf32>
    %10 = vector.broadcast %1 : vector<16x1xf32> to vector<16x256xf32>
    %11 = arith.addf %9, %10 : vector<16x256xf32>
    %cst_9 = arith.constant 0.000000e+00 : f32
    %12 = vector.broadcast %cst_9 : f32 to vector<16x256xf32>
    %13 = arith.maximumf %11, %12 : vector<16x256xf32>
    %cst_10 = arith.constant dense<0.000000e+00> : vector<32x256xf32>
    %14 = tpu.matmul %2, %13, %cst_10 {dimension_numbers = #tpu.dot_dimension_numbers<[1], [0], [0], [1], [0, 0, 1, 1], [], []>} : vector<32x16xf32>, vector<16x256xf32>, vector<32x256xf32> -> vector<32x256xf32>
    %15 = vector.broadcast %3 : vector<32x1xf32> to vector<32x256xf32>
    %16 = arith.addf %14, %15 : vector<32x256xf32>
    %17 = arith.mulf %16, %16 : vector<32x256xf32>
    %cst_11 = arith.constant dense<0.000000e+00> : vector<256xf32>
    %18 = vector.multi_reduction <add>, %17, %cst_11 [0] : vector<32x256xf32> to vector<256xf32>
    %19 = vector.shape_cast %18 : vector<256xf32> to vector<1x256xf32>
    %cst_12 = arith.constant 1.000000e-24 : f32
    %20 = vector.broadcast %cst_12 : f32 to vector<1x256xf32>
    %21 = arith.maximumf %19, %20 : vector<1x256xf32>
    %22 = math.rsqrt %21 : vector<1x256xf32>
    %23 = vector.broadcast %22 : vector<1x256xf32> to vector<32x256xf32>
    %24 = arith.mulf %16, %23 : vector<32x256xf32>
    %c0_13 = arith.constant 0 : index
    %c0_14 = arith.constant 0 : index
    %25 = arith.index_cast %5 : i32 to index
    %26 = vector.load %arg7[%c0_13, %c0_14, %25] : memref<1x32x256xf32, #tpu.memory_space<vmem>>, vector<1x32x256xf32>
    %27 = vector.shape_cast %26 : vector<1x32x256xf32> to vector<32x256xf32>
    %28 = vector.shape_cast %24 : vector<32x256xf32> to vector<1x32x256xf32>
    tpu.vector_store %arg7[%c0_13, %c0_14, %25], %28 {strides = array<i32>} : memref<1x32x256xf32, #tpu.memory_space<vmem>>, vector<1x32x256xf32>,
    %c1_i32 = arith.constant 1 : i32
    return
  }
  func.func @transform_0(%arg0: i32, %arg1: i32) -> (i32, i32, i32) {
    %c0_i32 = arith.constant 0 : i32
    %c0_i32_0 = arith.constant 0 : i32
    return %arg0, %c0_i32, %arg1 : i32, i32, i32
  }
  func.func @transform_1(%arg0: i32, %arg1: i32) -> (i32, i32) {
    %c0_i32 = arith.constant 0 : i32
    %c0_i32_0 = arith.constant 0 : i32
    %c0_i32_1 = arith.constant 0 : i32
    return %c0_i32, %c0_i32_0 : i32, i32
  }
  func.func @transform_2(%arg0: i32, %arg1: i32) -> (i32, i32) {
    %c0_i32 = arith.constant 0 : i32
    %c0_i32_0 = arith.constant 0 : i32
    %c0_i32_1 = arith.constant 0 : i32
    return %c0_i32, %c0_i32_0 : i32, i32
  }
  func.func @transform_3(%arg0: i32, %arg1: i32) -> (i32, i32) {
    %c0_i32 = arith.constant 0 : i32
    %c0_i32_0 = arith.constant 0 : i32
    %c0_i32_1 = arith.constant 0 : i32
    return %c0_i32, %c0_i32_0 : i32, i32
  }
  func.func @transform_4(%arg0: i32, %arg1: i32) -> (i32, i32) {
    %c0_i32 = arith.constant 0 : i32
    %c0_i32_0 = arith.constant 0 : i32
    %c0_i32_1 = arith.constant 0 : i32
    return %c0_i32, %c0_i32_0 : i32, i32
  }
  func.func @transform_5(%arg0: i32, %arg1: i32) -> (i32, i32, i32) {
    %c0_i32 = arith.constant 0 : i32
    %c0_i32_0 = arith.constant 0 : i32
    return %arg0, %c0_i32, %arg1 : i32, i32, i32
  }
}

</mosaic_0001>

<bundles_post_ra>
// kernel: projection_head_forward.2
= control target key start
LH: loop header
LB: loop body
LE: loop exit
PB: predicated region body
PF: predicated region fallthrough
CT: control target
= control target key end

     0   :  { %s494_s9 = smov 0   ;;  %s496_s10 = smov 0   ;;  %s560_s0 = inlined_call_operand.vmem [shape: f32[2,16,256], index: 0, kind: input, shape index: {}]   ;;  %s561_s1 = inlined_call_operand.vmem [shape: f32[1,16,1], index: 1, kind: output, shape index: {0}]   ;;  %s562_s2 = inlined_call_operand.vmem [shape: f32[1,16,16], index: 2, kind: output, shape index: {1}]  }
   0x1   :  { %s498_s11 = smov 0  }
   0x2 LB: > { %s28_s12 = sadd.s32 1, %s472_s10  ;;  %p413_p0 = scmp.ge.s32.totalorder %s476_s11, 1  ;;  %s476_s11 = sphi %s498_s11, %s13_s11   ;;  %s472_s10 = sphi %s496_s10, %s564_s10   ;;  %s468_s9 = sphi %s494_s9, %s563_s9  }
   0x3   : > { %p30_p1 = scmp.ge.s32.totalorder %s28_s12, 2  ;;  %p145_p2 = scmp.lt.s32.totalorder %s476_s11, 3 }
   0x5   : > { %s566_s12 = smov (%p30_p1, %s28_s12), 0  ;;  %p146_p3 = pnand %p413_p0, %p145_p2 }
   0x6   : > { %p179_p4 = scmp.lt.s32.totalorder (!%p146_p3), %s468_s9, 1  ;;  %p199_p5 = scmp.eq.s32.totalorder (!%p146_p3), %s468_s9, 0 }
   0x7   : > { %149 = sbr.rel (%p146_p3) target bundleno = 247 (0xf7), region = 24 }
   0xe   : > { %s568_s9 = smov (!%p179_p4, %s468_s9), 1  ;;  %204 = sbr.rel (!%p199_p5) target bundleno = 21 (0x15), region = 28 }
   0xf   : > { %s421_s13 = sshll.u32 %s568_s9, 5  ;;  %vm205_vm0 = vcmask (%p199_p5), 7168   ;;  %vm208_vm1 = vcmask (%p199_p5), 130048   ;;  %v478_v0 = vmov (%p199_p5), 0.0  }
  0x10   : > { %s186_s16 = scalar_lea.vmem %s560_s0, %s421_s13  ;;  %206 = vst.msk [vmem:[%s561_s1] sm:$0xff] (%p199_p5), %vm205_vm0, %v478_v0  ;;  %207 = vst.msk [vmem:[%s561_s1 + $0x8] sm:$0xff] (%p199_p5), %vm205_vm0, %v478_v0 }
  0x11   : > { %209 = vst.msk [vmem:[%s562_s2] sm:$0xff] (%p199_p5), %vm208_vm1, %v478_v0  ;;  %210 = vst.msk [vmem:[%s562_s2 + $0x8] sm:$0xff] (%p199_p5), %vm208_vm1, %v478_v0 }
  0x15 PF: > { %v212_v1 = vld [vmem:[%s186_s16 + $0x8] sm:$0xff]  ;;  %v214_v2 = vld [vmem:[%s186_s16 + $0x18] sm:$0xff]  ;;  %v211_v3 = vld [vmem:[%s186_s16] sm:$0xff]  ;;  %vm225_vm2 = vcmask 7168   ;;  %vm307_vm3 = vcmask 130048  }
  0x16   : > { %v423_v4 = vpack.c.bf16 %v214_v2, %v212_v1  ;;  %v213_v5 = vld [vmem:[%s186_s16 + $0x10] sm:$0xff]  ;;  %294 = vmatprep.mubr.f32.mxu0 %v212_v1  ;;  %299 = vmatprep.mubr.f32.mxu1 %v214_v2  ;;  %v217_v6 = vadd.f32 %v212_v1, %v211_v3 }
  0x17   : > { %v425_v7 = vpack.c.bf16 %v213_v5, %v211_v3  ;;  %v220_v8 = vadd.f32 %v214_v2, %v213_v5  ;;  %v215_v9 = vld [vmem:[%s561_s1] sm:$0xff]  ;;  %v216_v12 = vld [vmem:[%s561_s1 + $0x8] sm:$0xff] }
  0x18   : > { %424 = vmatprep.subr.bf16.mxu0 %v423_v4  ;;  %427 = vmatprep.subr.bf16.mxu1 %v423_v4  ;;  %v228_v15 = vld [vmem:[%s562_s2] sm:$0xff]  ;;  %v229_v16 = vld [vmem:[%s562_s2 + $0x8] sm:$0xff] }
  0x19   : > { %426 = vmatpush1.bf16.xpose.msra.mxu0 %v425_v7  ;;  %428 = vmatpush1.bf16.xpose.msra.mxu1 %v425_v7 }
  0x1a   : > { %218 = vadd.xlane.f32.xlu0 %v217_v6 }
  0x1e   : > { %221 = vadd.xlane.f32.xlu0 %v220_v8 }
  0x20   : > { %295 = vmatmul.mubr.f32.vlgmr.msra.gmra.mrb[0].mxu0 %v211_v3  ;;  %300 = vmatmul.mubr.f32.vlgmr.msra.gmra.mrb[0].mxu1 %v213_v5 }
  0xa7   : > { %v219_v10 = vpop.xlane.xlu0 %218 }
  0xa8   : > { %v223_v11 = vadd.f32 %v219_v10, %v215_v9 }
  0xaa   : > { %226 = vst.msk [vmem:[%s561_s1] sm:$0xff] %vm225_vm2, %v223_v11 }
  0xab   : > { %v222_v13 = vpop.xlane.xlu0 %221 }
  0xac   : > { %v224_v14 = vadd.f32 %v222_v13, %v216_v12 }
  0xae   : > { %227 = vst.msk [vmem:[%s561_s1 + $0x8] sm:$0xff] %vm225_vm2, %v224_v14 }
  0xf3   : > { %v296_v17 = vpop.f32.mrb[0].mxu0  ;;  %v301_v18 = vpop.f32.mrb[0].mxu1 }
  0xf4   : > { %v305_v19 = vadd.f32 %v296_v17, %v228_v15  ;;  %v306_v20 = vadd.f32 %v301_v18, %v229_v16  ;;  %v298_v21 = vpop.f32.mrb[1].mxu0  ;;  %v303_v22 = vpop.f32.mrb[1].mxu1 }
  0xf6   : > { %308 = vst.msk [vmem:[%s562_s2] sm:$0xff] %vm307_vm3, %v305_v19  ;;  %309 = vst.msk [vmem:[%s562_s2 + $0x8] sm:$0xff] %vm307_vm3, %v306_v20 }
  0xf7 PF: > { %s13_s11 = sadd.s32 1, %s476_s11   ;;  %s563_s9 = smov %s472_s10 }
  0xf8   : > { %p10_p6 = scmp.ge.s32.totalorder %s13_s11, 4   ;;  %s564_s10 = smov %s566_s12 }
  0xfa   :  { %12 = sbr.rel (!%p10_p6) target bundleno = 2 (0x2), region = 70 }

// kernel: projection_head_forward.3
= control target key start
LH: loop header
LB: loop body
LE: loop exit
PB: predicated region body
PF: predicated region fallthrough
CT: control target
= control target key end

     0   :  { %s749_s18 = smov 0   ;;  %s751_s19 = smov 0   ;;  %s834_s0 = inlined_call_operand.vmem [shape: f32[2,16,256], index: 0, kind: input, shape index: {}]   ;;  %s835_s1 = inlined_call_operand.vmem [shape: f32[16,16], index: 1, kind: input, shape index: {}]   ;;  %s836_s2 = inlined_call_operand.vmem [shape: f32[16,1], index: 2, kind: input, shape index: {}]   ;;  %s837_s3 = inlined_call_operand.vmem [shape: f32[32,16], index: 3, kind: input, shape index: {}]   ;;  %s838_s4 = inlined_call_operand.vmem [shape: f32[32,1], index: 4, kind: input, shape index: {}]   ;;  %s839_s5 = inlined_call_operand.vmem [shape: f32[2,32,256], index: 5, kind: output, shape index: {}]  }
   0x1   :  { %s753_s20 = smov 0  }
   0x2 LB: > { %s27_s21 = sadd.s32 1, %s711_s19  ;;  %p636_p0 = scmp.ge.s32.totalorder %s715_s20, 1  ;;  %s715_s20 = sphi %s753_s20, %s15_s20   ;;  %s711_s19 = sphi %s751_s19, %s841_s19   ;;  %s707_s18 = sphi %s749_s18, %s840_s18  }
   0x3   : > { %p29_p1 = scmp.ge.s32.totalorder %s27_s21, 2  ;;  %p208_p2 = scmp.lt.s32.totalorder %s715_s20, 3 }
   0x5   : > { %s843_s21 = smov (%p29_p1, %s27_s21), 0  ;;  %p209_p3 = pnand %p636_p0, %p208_p2 }
   0x6   : > { %p245_p4 = scmp.lt.s32.totalorder (!%p209_p3), %s707_s18, 1  ;;  %v717_v0 = vmov (!%p209_p3), 0.0   ;;  %v718_v1 = vmov (!%p209_p3), 0   ;;  %v266_v2 = vld [vmem:[%s836_s2] sm:$0xff] (!%p209_p3)  ;;  %v267_v3 = vld [vmem:[%s836_s2 + $0x8] sm:$0xff] (!%p209_p3)  ;;  %v274_v9 = vld [vmem:[%s838_s4 + $0x10] sm:$0xff] (!%p209_p3) }
   0x7   : > { %212 = sbr.rel (%p209_p3) target bundleno = 508 (0x1fc), region = 40  ;;  %361 = vmatprep.mubr.f32.mxu0 (!%p209_p3), %v717_v0  ;;  %687 = vset.pattern.permute.xlu0 (!%p209_p3), %v718_v1  ;;  %v264_v11 = vld [vmem:[%s835_s1] sm:$0xff] (!%p209_p3)  ;;  %vm290_vm0 = vcmask (!%p209_p3), 130048   ;;  %v265_v12 = vld [vmem:[%s835_s1 + $0x8] sm:$0xff] (!%p209_p3)  ;;  %v275_v15 = vld [vmem:[%s838_s4 + $0x18] sm:$0xff] (!%p209_p3) }
   0x8   : > { %282 = vperm.xlu0 (!%p209_p3), %687, %v266_v2   ;;  %480 = vmatprep.mubr.f32.mxu1 (!%p209_p3), %v717_v0  ;;  %v272_v13 = vld [vmem:[%s838_s4] sm:$0xff] (!%p209_p3)  ;;  %v273_v14 = vld [vmem:[%s838_s4 + $0x8] sm:$0xff] (!%p209_p3)  ;;  %v270_v34 = vld [vmem:[%s837_s3 + $0x10] sm:$0xff] (!%p209_p3) }
   0x9   : > { %688 = vset.pattern.permute.xlu1 (!%p209_p3), %v718_v1  ;;  %v268_v32 = vld [vmem:[%s837_s3] sm:$0xff] (!%p209_p3)  ;;  %v269_v33 = vld [vmem:[%s837_s3 + $0x8] sm:$0xff] (!%p209_p3)  ;;  %v271_v35 = vld [vmem:[%s837_s3 + $0x18] sm:$0xff] (!%p209_p3) }
   0xa   : > { %380 = vperm.xlu1 (!%p209_p3), %688, %v272_v13  }
   0xc   : > { %287 = vperm.xlu0 (!%p209_p3), %687, %v267_v3  }
   0xe   : > { %s845_s18 = smov (!%p245_p4, %s707_s18), 1  ;;  %385 = vperm.xlu1 %688, %v273_v14  }
   0xf   : > { %s649_s26 = sshll.u32 %s845_s18, 5 }
  0x10   : > { %s252_s29 = scalar_lea.vmem %s834_s0, %s649_s26  ;;  %390 = vperm.xlu0 %687, %v274_v9  }
  0x11   : > { %v277_v4 = vld [vmem:[%s252_s29 + $0x8] sm:$0xff]  ;;  %v279_v5 = vld [vmem:[%s252_s29 + $0x18] sm:$0xff]  ;;  %v276_v6 = vld [vmem:[%s252_s29] sm:$0xff] }
  0x12   : > { %v651_v7 = vpack.c.bf16 %v279_v5, %v277_v4  ;;  %v278_v8 = vld [vmem:[%s252_s29 + $0x10] sm:$0xff]  ;;  %395 = vperm.xlu1 %688, %v275_v15   ;;  %s650_s29 = sshll.u32 %s845_s18, 6 }
  0x13   : > { %v653_v10 = vpack.c.bf16 %v278_v8, %v276_v6  ;;  %s262_s7 = scalar_lea.vmem %s839_s5, %s650_s29 }
  0x14   : > { %652 = vmatprep.subr.bf16.mxu0 %v651_v7 }
  0x15   : > { %654 = vmatpush1.bf16.msra.mxu0 %v653_v10 }
  0x18   : > { %641 = vmatmul.mubr.msk.f32.vlgmr.msra.gmra.mrb[0].mxu0 %vm290_vm0, %v264_v11 }
  0x19   : > { %367 = vmatprep.mubr.f32.mxu0 %v717_v0 }
  0x1c   : > { %642 = vmatmul.mubr.msk.f32.gmra.mrb[2].mxu0 %vm290_vm0, %v265_v12 }
  0x1d   : > { %474 = vmatprep.mubr.f32.mxu0 %v717_v0 }
  0x87   : > { %v283_v16 = vpop.permute.xlu0 %282 }
  0x89   : > { %v381_v36 = vpop.permute.xlu1 %380 }
  0x8b   : > { %v288_v20 = vpop.permute.xlu0 %287 }
  0x8d   : > { %v386_v37 = vpop.permute.xlu1 %385 }
  0x8f   : > { %v391_v48 = vpop.permute.xlu0 %390 }
  0x91   : > { %v396_v58 = vpop.permute.xlu1 %395 }
  0xeb   : > { %v363_v17 = vpop.f32.mrb[0].mxu0 }
  0xec   : > { %v365_v18 = vpop.f32.mrb[1].mxu0  ;;  %v364_v19 = vadd.f32 %v363_v17, %v283_v16 }
  0xed   : > { %v366_v21 = vadd.f32 %v365_v18, %v283_v16 }
  0xee   : > { %v374_v26 = vmax.f32 %v364_v19, 0.0 }
  0xef   : > { %v369_v22 = vpop.f32.mrb[2].mxu0  ;;  %v375_v28 = vmax.f32 %v366_v21, 0.0 }
  0xf0   : > { %v370_v23 = vadd.f32 %v369_v22, %v288_v20  ;;  %v371_v24 = vpop.f32.mrb[3].mxu0 }
  0xf1   : > { %v372_v25 = vadd.f32 %v371_v24, %v288_v20 }
  0xf2   : > { %v376_v27 = vmax.f32 %v370_v23, 0.0 }
  0xf3   : > { %v377_v29 = vmax.f32 %v372_v25, 0.0 }
  0xf4   : > { %v657_v30 = vpack.c.bf16 %v376_v27, %v374_v26 }
  0xf5   : > { %v655_v31 = vpack.c.bf16 %v377_v29, %v375_v28 }
  0xf7   : > { %656 = vmatprep.subr.bf16.mxu0 %v655_v31  ;;  %659 = vmatprep.subr.bf16.mxu1 %v655_v31 }
  0xf8   : > { %658 = vmatpush1.bf16.msra.mxu0 %v657_v30  ;;  %660 = vmatpush1.bf16.msra.mxu1 %v657_v30 }
  0xfb   : > { %643 = vmatmul.mubr.msk.f32.vlgmr.msra.gmra.mrb[4].mxu0 %vm290_vm0, %v268_v32  ;;  %644 = vmatmul.mubr.msk.f32.vlgmr.msra.gmra.mrb[0].mxu1 %vm290_vm0, %v269_v33 }
  0xfc   : > { %486 = vmatprep.mubr.f32.mxu1 %v717_v0 }
  0xff   : > { %645 = vmatmul.mubr.msk.f32.gmra.mrb[2].mxu1 %vm290_vm0, %v270_v34 }
 0x100   : > { %492 = vmatprep.mubr.f32.mxu1 %v717_v0 }
 0x103   : > { %646 = vmatmul.mubr.msk.f32.gmra.mrb[4].mxu1 %vm290_vm0, %v271_v35 }
 0x1ce   : > { %v476_v38 = vpop.f32.mrb[4].mxu0  ;;  %v482_v39 = vpop.f32.mrb[0].mxu1 }
 0x1cf   : > { %v477_v40 = vadd.f32 %v476_v38, %v381_v36  ;;  %v483_v41 = vadd.f32 %v482_v39, %v386_v37  ;;  %v478_v42 = vpop.f32.mrb[5].mxu0  ;;  %v484_v43 = vpop.f32.mrb[1].mxu1 }
 0x1d0   : > { %v479_v44 = vadd.f32 %v478_v42, %v381_v36  ;;  %v485_v45 = vadd.f32 %v484_v43, %v386_v37 }
 0x1d1   : > { %v499_v46 = vmul.f32 %v477_v40, %v477_v40  ;;  %v501_v47 = vmul.f32 %v483_v41, %v483_v41 }
 0x1d2   : > { %v500_v49 = vmul.f32 %v479_v44, %v479_v44  ;;  %v502_v50 = vmul.f32 %v485_v45, %v485_v45  ;;  %v488_v51 = vpop.f32.mrb[2].mxu1 }
 0x1d3   : > { %v507_v52 = vadd.f32 %v501_v47, %v499_v46  ;;  %v489_v53 = vadd.f32 %v488_v51, %v391_v48  ;;  %v490_v54 = vpop.f32.mrb[3].mxu1 }
 0x1d4   : > { %v516_v55 = vadd.f32 %v502_v50, %v500_v49  ;;  %v491_v56 = vadd.f32 %v490_v54, %v391_v48 }
 0x1d5   : > { %v503_v57 = vmul.f32 %v489_v53, %v489_v53 }
 0x1d6   : > { %v504_v59 = vmul.f32 %v491_v56, %v491_v56  ;;  %v494_v60 = vpop.f32.mrb[4].mxu1 }
 0x1d7   : > { %v508_v61 = vadd.f32 %v507_v52, %v503_v57  ;;  %v495_v62 = vadd.f32 %v494_v60, %v396_v58  ;;  %v496_v63 = vpop.f32.mrb[5].mxu1 }
 0x1d8   : > { %v517_v0 = vadd.f32 %v516_v55, %v504_v59  ;;  %v497_v1 = vadd.f32 %v496_v63, %v396_v58 }
 0x1d9   : > { %v505_v2 = vmul.f32 %v495_v62, %v495_v62 }
 0x1da   : > { %v506_v3 = vmul.f32 %v497_v1, %v497_v1 }
 0x1db   : > { %v509_v4 = vadd.f32 %v508_v61, %v505_v2 }
 0x1dc   : > { %v518_v5 = vadd.f32 %v517_v0, %v506_v3 }
 0x1dd   : > { %v510_v6 = vrot.slane %v509_v4, 4 }
 0x1de   : > { %v519_v7 = vrot.slane %v518_v5, 4 }
 0x1df   : > { %v511_v8 = vadd.f32 %v510_v6, %v509_v4 }
 0x1e0   : > { %v520_v9 = vadd.f32 %v519_v7, %v518_v5 }
 0x1e1   : > { %v512_v10 = vrot.slane %v511_v8, 2 }
 0x1e2   : > { %v521_v11 = vrot.slane %v520_v9, 2 }
 0x1e3   : > { %v513_v12 = vadd.f32 %v512_v10, %v511_v8 }
 0x1e4   : > { %v522_v13 = vadd.f32 %v521_v11, %v520_v9 }
 0x1e5   : > { %v514_v14 = vrot.slane %v513_v12, 1 }
 0x1e6   : > { %v523_v15 = vrot.slane %v522_v13, 1 }
 0x1e7   : > { %v515_v16 = vadd.f32 %v514_v14, %v513_v12 }
 0x1e8   : > { %v524_v17 = vadd.f32 %v523_v15, %v522_v13 }
 0x1e9   : > { %v525_v18 = vmax.f32 %v515_v16, 1e-24 }
 0x1ea   : > { %v526_v19 = vmax.f32 %v524_v17, 1e-24 }
 0x1eb   : > { %689 = vrsqrt.f32 %v525_v18 }
 0x1ec   : > { %691 = vrsqrt.f32 %v526_v19 }
 0x1f5   : > { %v690_v20 = vpop.eup %689 }
 0x1f6   : > { %v692_v21 = vpop.eup %691  ;;  %v529_v22 = vmul.f32 %v690_v20, %v477_v40  ;;  %v531_v23 = vmul.f32 %v690_v20, %v483_v41  ;;  %v533_v24 = vmul.f32 %v690_v20, %v489_v53  ;;  %v535_v25 = vmul.f32 %v690_v20, %v495_v62 }
 0x1f7   : > { %v530_v26 = vmul.f32 %v692_v21, %v479_v44  ;;  %v532_v27 = vmul.f32 %v692_v21, %v485_v45  ;;  %v534_v28 = vmul.f32 %v692_v21, %v491_v56  ;;  %v536_v29 = vmul.f32 %v692_v21, %v497_v1 }
 0x1f8   : > { %537 = vst [vmem:[%s262_s7] sm:$0xff] %v529_v22  ;;  %539 = vst [vmem:[%s262_s7 + $0x10] sm:$0xff] %v531_v23 }
 0x1f9   : > { %541 = vst [vmem:[%s262_s7 + $0x20] sm:$0xff] %v533_v24  ;;  %543 = vst [vmem:[%s262_s7 + $0x30] sm:$0xff] %v535_v25 }
 0x1fa   : > { %538 = vst [vmem:[%s262_s7 + $0x8] sm:$0xff] %v530_v26  ;;  %540 = vst [vmem:[%s262_s7 + $0x18] sm:$0xff] %v532_v27 }
 0x1fb   : > { %542 = vst [vmem:[%s262_s7 + $0x28] sm:$0xff] %v534_v28  ;;  %544 = vst [vmem:[%s262_s7 + $0x38] sm:$0xff] %v536_v29 }
 0x1fc PF: > { %s15_s20 = sadd.s32 1, %s715_s20   ;;  %s840_s18 = smov %s711_s19 }
 0x1fd   : > { %p12_p5 = scmp.ge.s32.totalorder %s15_s20, 4   ;;  %s841_s19 = smov %s843_s21 }
 0x1ff   :  { %14 = sbr.rel (!%p12_p5) target bundleno = 2 (0x2), region = 70 }

</bundles_post_ra>
